<compile_context>
chip_gen: v6e
topology: v6e:2x2x1
jax: 0.10.0
libtpu: 0.0.40
codegen_flags: <defaults>
</compile_context>

<pallas_src>
import jax
import jax.numpy as jnp
from jax.experimental import pallas as pl
from jax.experimental.pallas import tpu as pltpu


def _make_squeeze_dma_kernel(dim: int):
    """Kernel: one whole-array DMA from the squeezed HBM view to the output."""

    def kernel(x_hbm, o_hbm, sem):
        # Indexing the size-1 axis with 0 drops it from the ref view without
        # moving any data; the view is contiguous and shape-identical to the
        # output, so this lowers to a single linear HBM->HBM DMA.
        src = x_hbm.at[(slice(None),) * dim + (0,)]
        cp = pltpu.make_async_copy(src, o_hbm, sem)
        cp.start()
        cp.wait()

    return kernel


def squeeze(x: jax.Array, dim: int, *, use_pallas: bool = True) -> jax.Array:
    """Pallas equivalent of torch.squeeze(x, dim) (with the size-1 assertion)."""
    ndim = x.ndim
    if dim < 0:
        dim += ndim
    assert 0 <= dim < ndim, f"Squeeze: dim {dim} out of range for rank {ndim}"
    assert x.shape[dim] == 1, (
        f"Squeeze: expected size 1 at dim {dim}, got {x.shape[dim]}"
    )

    out_shape = tuple(s for i, s in enumerate(x.shape) if i != dim)

    # Metadata-only path: free bitcast, zero HBM traffic.  This is the right
    # choice whenever the op does not need to exist as a Pallas fusion anchor.
    # (Rank-0 results also take this path; a scalar DMA buys nothing.)
    if not use_pallas or len(out_shape) == 0:
        return jnp.squeeze(x, axis=dim)

    itemsize = jnp.dtype(x.dtype).itemsize
    return pl.pallas_call(
        _make_squeeze_dma_kernel(dim),
        out_shape=jax.ShapeDtypeStruct(out_shape, x.dtype),
        in_specs=[pl.BlockSpec(memory_space=pl.ANY)],
        out_specs=pl.BlockSpec(memory_space=pl.ANY),
        scratch_shapes=[pltpu.SemaphoreType.DMA(())],
        cost_estimate=pl.CostEstimate(
            flops=0,
            transcendentals=0,
            bytes_accessed=2 * x.size * itemsize,
        ),
    )(x)


class Squeeze:
    """Mirror of the PyTorch module; no parameters."""

    def __init__(self, dim, use_pallas: bool = True, **kwargs):
        self._dim = dim
        self._use_pallas = use_pallas

    def __call__(self, x):
        return squeeze(x, self._dim, use_pallas=self._use_pallas)


if __name__ == "__main__":
    key = jax.random.PRNGKey(0)

    # NCHW input with a singleton channel dim: (batch=2, channels=1, H=16, W=16).
    x = jax.random.normal(key, (2, 1, 16, 16), dtype=jnp.float32)
    y = jax.block_until_ready(Squeeze(dim=1)(x))
    y_ref = jnp.squeeze(x, axis=1)
    assert y.shape == (2, 16, 16), y.shape
    assert y.dtype == x.dtype
    assert jnp.array_equal(y, y_ref), "mismatch vs reference squeeze (dim=1)"

    # Trailing (lane) axis: the single-DMA kernel handles it with no relayout,
    # since the size-1 axis is dropped on the HBM ref view, not in VMEM.
    x2 = jax.random.normal(jax.random.PRNGKey(1), (2, 4, 16, 1), dtype=jnp.float32)
    y2 = jax.block_until_ready(Squeeze(dim=-1)(x2))
    assert y2.shape == (2, 4, 16), y2.shape
    assert jnp.array_equal(y2, jnp.squeeze(x2, axis=-1)), "mismatch (dim=-1)"

    # Recommended production path: zero-copy metadata reshape (no kernel at all).
    y3 = jax.block_until_ready(Squeeze(dim=1, use_pallas=False)(x))
    assert jnp.array_equal(y3, y_ref)

    print("KERNEL_OK")
</pallas_src>

<mosaic_0001>
module attributes {stable_mosaic.version = 11 : i64} {
  func.func @kernel(%arg0: memref<2x1x16x16xf32, #tpu.memory_space<any>>, %arg1: memref<2x16x16xf32, #tpu.memory_space<any>>, %arg2: memref<!tpu.dma_semaphore, #tpu.memory_space<semaphore_mem>>) attributes {dimension_semantics = [], scalar_prefetch = 0 : i64, scratch_operands = 1 : i64, tpu.core_type = #tpu.core_type<tc>} {
    %c0_i32 = arith.constant 0 : i32
    %c0_i32_0 = arith.constant 0 : i32
    %c0_i32_1 = arith.constant 0 : i32
    %c0_i32_2 = arith.constant 0 : i32
    %0 = tpu.memref_slice %arg0[%c0_i32_0, %c0_i32, %c0_i32_1, %c0_i32_2] : memref<2x1x16x16xf32, #tpu.memory_space<any>> -> memref<2x1x16x16xf32, #tpu.memory_space<any>>
    %1 = tpu.memref_squeeze %0 : memref<2x1x16x16xf32, #tpu.memory_space<any>> -> memref<2x16x16xf32, #tpu.memory_space<any>>
    tpu.enqueue_dma source(%1 : memref<2x16x16xf32, #tpu.memory_space<any>>) target(%arg1 : memref<2x16x16xf32, #tpu.memory_space<any>>) target_semaphore(%arg2 : memref<!tpu.dma_semaphore, #tpu.memory_space<semaphore_mem>>)
    %c0_i32_3 = arith.constant 0 : i32
    %c0_i32_4 = arith.constant 0 : i32
    %c0_i32_5 = arith.constant 0 : i32
    %c0_i32_6 = arith.constant 0 : i32
    %2 = tpu.memref_slice %arg0[%c0_i32_4, %c0_i32_3, %c0_i32_5, %c0_i32_6] : memref<2x1x16x16xf32, #tpu.memory_space<any>> -> memref<2x1x16x16xf32, #tpu.memory_space<any>>
    %3 = tpu.memref_squeeze %2 : memref<2x1x16x16xf32, #tpu.memory_space<any>> -> memref<2x16x16xf32, #tpu.memory_space<any>>
    tpu.wait_dma2 semaphore(%arg2 : memref<!tpu.dma_semaphore, #tpu.memory_space<semaphore_mem>>) src(%3 : memref<2x16x16xf32, #tpu.memory_space<any>>) dst(%arg1 : memref<2x16x16xf32, #tpu.memory_space<any>>)
    return
  }
}

</mosaic_0001>

<bundles_post_ra>
// kernel: tpu_custom_call.1
= control target key start
LH: loop header
LB: loop body
LE: loop exit
PB: predicated region body
PF: predicated region fallthrough
CT: control target
= control target key end

     0   :  { %s29_s6 = smov [#allocation2]   ;;  %s30_s7 = smov 131072   ;;  %s48_s0 = inlined_call_operand.hbm [shape: f32[2,1,16,16], index: 0, kind: input, shape index: {}]   ;;  %s49_s1 = inlined_call_operand.hbm [shape: f32[2,16,16], index: 1, kind: output, shape index: {}]  }
   0x1   :  { %s31_s8 = smov 0  }
   0x2   :  { %12 = dma.general %s48_s0, 512, %s49_s1, %s29_s6, %s30_s7, [#allocation4], %s31_s8, 0  }
   0x3   :  { %27 = dma.done.wait [#allocation2], 512 }
   0x4   :  { %28 = vsyncadd [#allocation2], 4294966784 }
   0x5   :  { %17 = vsyncmov [#allocation2] }
   0x8   :  { %s18_s13 = vpop.sfrf %17 }
   0x9   :  { %p23_p0 = scmp.ne.s32.totalorder %s18_s13, 0 }
   0xb   :  { %22 = shalt.err (%p23_p0)  }

</bundles_post_ra>
